<compile_context>
chip_gen: v7x
topology: tpu7x:2x2x1
jax: 0.10.0
libtpu: 0.0.40
codegen_flags: <defaults>
</compile_context>

<pallas_src>
import math

import numpy as np
import jax
import jax.numpy as jnp
from jax.experimental import pallas as pl
from jax.experimental.pallas import tpu as pltpu


_SMALL_FALLBACK_ELEMS = 2048             # below this, XLA's fused pad wins
_VMEM_LIMIT_BYTES = 32 * 1024 * 1024     # conservative across v5e / v6e / v7x
_TILE_BYTES_TARGET = 16 * 1024 * 1024    # double-buffered (in + out) tile budget


def _compute_pads(in_shape, target_shape, where):
    """Replicates pad_to_shape's padding computation, returning per-dim
    (pad_before, pad_after) pairs with the flat-reversal swap applied."""
    if len(in_shape) != len(target_shape):
        raise ValueError("input rank must match target shape rank")
    pairs = []
    for dim in range(len(target_shape)):
        diff = target_shape[dim] - in_shape[dim]
        if diff > 0:
            if diff % 2 == 0:
                if where == 'center':
                    pair = (diff // 2, diff // 2)
                elif where == 'start':
                    pair = (0, diff)
                elif where == 'end':
                    pair = (diff, 0)
                else:
                    raise ValueError(f'Invalid where: {where}')
            elif diff == 1:
                if where in ('center', 'end'):
                    pair = (1, 0)
                elif where == 'start':
                    pair = (0, 1)
                else:
                    raise ValueError(f'Invalid where: {where}')
            elif where == 'center':
                pair = (diff // 2, diff // 2 + 1)
            elif where == 'start':
                pair = (0, diff)
            elif where == 'end':
                pair = (diff, 0)
            else:
                raise ValueError(f'Invalid where: {where}')
        else:
            pair = (0, 0)
        pairs.append(pair)
    # F.pad sees the flat-reversed list: pair (x, y) for dim d -> before=y, after=x
    return [(y, x) for (x, y) in pairs]


def _row_strides(dims):
    strides = [1] * len(dims)
    for d in range(len(dims) - 2, -1, -1):
        strides[d] = strides[d + 1] * dims[d + 1]
    return strides


def _lead_row_maps(lead_out, lead_in, lead_before):
    """Collapsed output leading-row index -> (clamped input row, valid flag)."""
    k = len(lead_out)
    if k == 0:
        return np.zeros((1,), np.int32), np.ones((1,), np.int32)
    r_out = int(np.prod(lead_out))
    idx = np.indices(lead_out).reshape(k, r_out)                     # row-major
    src = idx.astype(np.int64) - np.asarray(lead_before, np.int64).reshape(k, 1)
    in_dims = np.asarray(lead_in, np.int64).reshape(k, 1)
    ok = np.all((src >= 0) & (src < in_dims), axis=0)
    src = np.clip(src, 0, in_dims - 1)
    strides = np.asarray(_row_strides(list(lead_in)), np.int64).reshape(k, 1)
    rows = (src * strides).sum(axis=0)
    return rows.astype(np.int32), ok.astype(np.int32)


def _make_hw_writer(pads_hw, in_hw, out_hw, pad_value, dtype):
    """Writes one block: pad frame + interior, each element exactly once."""
    (b_h, a_h), (b_w, a_w) = pads_hw
    h_in, w_in = in_hw
    h_out, w_out = out_hw
    no_hw_pad = (b_h == 0 and a_h == 0 and b_w == 0 and a_w == 0)

    def write(x_ref, o_ref):
        tr = o_ref.shape[0]
        if no_hw_pad:
            # trailing dims unpadded -> single aligned full-block store
            o_ref[...] = x_ref[...]
            return

        def fill(h0, h1, w0, w1):
            o_ref[:, h0:h1, w0:w1] = jnp.full(
                (tr, h1 - h0, w1 - w0), pad_value, dtype=dtype)

        if b_h:
            fill(0, b_h, 0, w_out)
        if a_h:
            fill(b_h + h_in, h_out, 0, w_out)
        if b_w:
            fill(b_h, b_h + h_in, 0, b_w)
        if a_w:
            fill(b_h, b_h + h_in, b_w + w_in, w_out)
        o_ref[:, b_h:b_h + h_in, b_w:b_w + w_in] = x_ref[...]

    return write


def pad_to_shape_pallas(x, shape, where='center', mode='constant', value=None,
                        use_pallas=None, block_rows=None):
    shape = tuple(int(s) for s in shape)
    if tuple(x.shape) == shape:
        return x
    if mode != 'constant':
        # TODO(synk): reflect / replicate / circular pad modes not implemented in the kernel.
        raise NotImplementedError(f"mode={mode!r} not supported in the Pallas kernel")

    pads = _compute_pads(x.shape, shape, where)
    pad_value = 0.0 if value is None else value
    # Output shape matches F.pad semantics (dims with diff <= 0 stay unchanged).
    out_shape = tuple(int(s + b + a) for s, (b, a) in zip(x.shape, pads))
    if out_shape == tuple(x.shape):
        return x

    ndim = x.ndim
    itemsize = jnp.dtype(x.dtype).itemsize
    total_out = math.prod(out_shape)
    total_bytes = int((x.size + total_out) * itemsize)

    kernel_ok = ndim >= 2
    if kernel_ok:
        h_in, w_in = int(x.shape[-2]), int(x.shape[-1])
        h_out, w_out = out_shape[-2], out_shape[-1]
        # per-row footprint: double-buffered input plane + output plane
        per_row_bytes = 2 * (h_in * w_in + h_out * w_out) * itemsize
        # TODO(synk): tile H/W for planes too large for VMEM instead of falling back.
        kernel_ok = per_row_bytes <= _VMEM_LIMIT_BYTES - (2 << 20)

    if use_pallas is None:
        use_pallas = kernel_ok and total_out >= _SMALL_FALLBACK_ELEMS
    use_pallas = bool(use_pallas) and kernel_ok

    if not use_pallas:
        # small-tensor / too-big-plane / rank<2 fast path: XLA fused pad
        return jnp.pad(x, pads, mode='constant', constant_values=pad_value)

    lead_in = tuple(int(d) for d in x.shape[:-2])
    lead_out = tuple(out_shape[:-2])
    lead_before = tuple(b for (b, _) in pads[:-2])
    r_in = math.prod(lead_in) if lead_in else 1
    r_out = math.prod(lead_out) if lead_out else 1
    any_lead_pad = lead_in != lead_out

    hw_writer = _make_hw_writer((pads[-2], pads[-1]), (h_in, w_in),
                                (h_out, w_out), pad_value, x.dtype)
    x3 = x.reshape(r_in, h_in, w_in)
    cparams = pltpu.CompilerParams(
        dimension_semantics=("parallel",),
        vmem_limit_bytes=_VMEM_LIMIT_BYTES)
    cost = pl.CostEstimate(flops=0, transcendentals=0, bytes_accessed=total_bytes)

    if not any_lead_pad:
        # --- Regime A: only trailing (H/W) padding -------------------------
        # Many rows per grid step -> large DMAs, amortized per-step overhead.
        if block_rows is None:
            tr = max(1, min(r_out, _TILE_BYTES_TARGET // per_row_bytes))
        else:
            tr = max(1, min(r_out, int(block_rows)))

        def kernel_a(x_ref, o_ref):
            hw_writer(x_ref, o_ref)

        out3 = pl.pallas_call(
            kernel_a,
            out_shape=jax.ShapeDtypeStruct((r_out, h_out, w_out), x.dtype),
            grid=(pl.cdiv(r_out, tr),),
            in_specs=[pl.BlockSpec((tr, h_in, w_in), lambda r: (r, 0, 0))],
            out_specs=pl.BlockSpec((tr, h_out, w_out), lambda r: (r, 0, 0)),
            compiler_params=cparams,
            cost_estimate=cost,
        )(x3)
    else:
        # --- Regime B: leading-dim padding ----------------------------------
        # Per output row; source row + validity scalar-prefetched into SMEM.
        rows_np, valid_np = _lead_row_maps(lead_out, lead_in, lead_before)
        rows = jnp.asarray(rows_np)
        valid = jnp.asarray(valid_np)
        dtype = x.dtype

        def kernel_b(rows_ref, valid_ref, x_ref, o_ref):
            r = pl.program_id(0)
            is_valid = valid_ref[r] != 0

            @pl.when(is_valid)
            def _():
                hw_writer(x_ref, o_ref)

            @pl.when(jnp.logical_not(is_valid))
            def _():
                o_ref[...] = jnp.full((1, h_out, w_out), pad_value, dtype=dtype)

        grid_spec = pltpu.PrefetchScalarGridSpec(
            num_scalar_prefetch=2,
            grid=(r_out,),
            in_specs=[pl.BlockSpec(
                (1, h_in, w_in),
                lambda r, rows_ref, valid_ref: (rows_ref[r], 0, 0))],
            out_specs=pl.BlockSpec(
                (1, h_out, w_out),
                lambda r, rows_ref, valid_ref: (r, 0, 0)),
        )
        out3 = pl.pallas_call(
            kernel_b,
            out_shape=jax.ShapeDtypeStruct((r_out, h_out, w_out), x.dtype),
            grid_spec=grid_spec,
            compiler_params=cparams,
            cost_estimate=cost,
        )(rows, valid, x3)

    return out3.reshape(out_shape)


class PadToShape:
    """JAX/Pallas counterpart of torchzero PadToShape (no learnable params)."""

    def __init__(self, shape, where='center', mode='constant', value=None):
        self.shape = tuple(shape)
        self.where = where
        self.mode = mode
        self.value = value

    def __call__(self, x):
        return pad_to_shape_pallas(x, self.shape, where=self.where,
                                   mode=self.mode, value=self.value)


def _reference(x, shape, where, value):
    pads = _compute_pads(x.shape, shape, where)
    val = 0.0 if value is None else value
    return jnp.pad(x, pads, mode='constant', constant_values=val)


if __name__ == "__main__":
    key = jax.random.PRNGKey(0)
    x = jax.random.normal(key, (2, 4, 16, 16), dtype=jnp.float32)

    cases = [
        # (target_shape, where, value, dtype)
        ((2, 5, 24, 32), 'center', None, jnp.float32),   # lead pad (diff==1) + H/W pads
        ((2, 5, 24, 32), 'start', None, jnp.float32),
        ((2, 5, 24, 32), 'end', None, jnp.float32),
        ((2, 5, 24, 32), 'center', 1.5, jnp.float32),    # non-zero constant value
        ((2, 8, 16, 16), 'start', None, jnp.float32),    # leading-dim-only pad
        ((2, 4, 24, 32), 'center', None, jnp.float32),   # regime A: H/W pads only
        ((2, 5, 24, 32), 'center', None, jnp.bfloat16),  # narrow-dtype path
    ]

    ok = True
    for target_shape, where, value, dtype in cases:
        xi = x.astype(dtype)
        mod = PadToShape(target_shape, where=where, mode='constant', value=value)
        out = jax.block_until_ready(mod(xi))
        ref = _reference(xi, target_shape, where, value)
        if (out.shape != tuple(target_shape) or out.dtype != xi.dtype
                or not bool(jnp.array_equal(out, ref))):
            ok = False

    # Regime A with a forced partial final block (R=8 rows, 3 rows per block).
    x3 = jax.random.normal(jax.random.PRNGKey(0), (8, 16, 16), dtype=jnp.float32)
    tgt = (8, 24, 128)
    out = jax.block_until_ready(
        pad_to_shape_pallas(x3, tgt, where='end', use_pallas=True, block_rows=3))
    ref = _reference(x3, tgt, 'end', None)
    if out.shape != tgt or not bool(jnp.array_equal(out, ref)):
        ok = False

    if ok:
        print("KERNEL_OK")
</pallas_src>

<mosaic_0001>
module attributes {stable_mosaic.version = 11 : i64} {
  func.func @kernel_b(%arg0: i32, %arg1: memref<10xi32, #tpu.memory_space<smem>>, %arg2: memref<10xi32, #tpu.memory_space<smem>>, %arg3: memref<1x16x16xf32, #tpu.memory_space<vmem>>, %arg4: memref<1x24x32xf32, #tpu.memory_space<vmem>>) attributes {dimension_semantics = [#tpu.dimension_semantics<parallel>], iteration_bounds = array<i64: 10>, scalar_prefetch = 2 : i64, scratch_operands = 0 : i64, tpu.core_type = #tpu.core_type<tc>, window_params = [{transform_indices = @transform_0, window_bounds = array<i64: 1, 16, 16>}, {transform_indices = @transform_1, window_bounds = array<i64: 1, 24, 32>}]} {
    %0 = arith.index_cast %arg0 : i32 to index
    %1 = memref.load %arg2[%0] : memref<10xi32, #tpu.memory_space<smem>>
    %c0_i32 = arith.constant 0 : i32
    %2 = arith.cmpi ne, %1, %c0_i32 : i32
    %3 = arith.extui %2 : i1 to i32
    %c0_i32_0 = arith.constant 0 : i32
    %4 = arith.cmpi ne, %3, %c0_i32_0 : i32
    scf.if %4 {
      %cst = arith.constant 0.000000e+00 : f32
      %8 = vector.broadcast %cst : f32 to vector<1x4x32xf32>
      %c0 = arith.constant 0 : index
      %c0_2 = arith.constant 0 : index
      %c0_3 = arith.constant 0 : index
      %9 = vector.load %arg4[%c0, %c0_2, %c0_3] : memref<1x24x32xf32, #tpu.memory_space<vmem>>, vector<1x4x32xf32>
      tpu.vector_store %arg4[%c0, %c0_2, %c0_3], %8 {strides = array<i32>} : memref<1x24x32xf32, #tpu.memory_space<vmem>>, vector<1x4x32xf32>,
      %cst_4 = arith.constant 0.000000e+00 : f32
      %10 = vector.broadcast %cst_4 : f32 to vector<1x4x32xf32>
      %c0_5 = arith.constant 0 : index
      %c20 = arith.constant 20 : index
      %c0_6 = arith.constant 0 : index
      %11 = vector.load %arg4[%c0_5, %c20, %c0_6] : memref<1x24x32xf32, #tpu.memory_space<vmem>>, vector<1x4x32xf32>
      tpu.vector_store %arg4[%c0_5, %c20, %c0_6], %10 {strides = array<i32>} : memref<1x24x32xf32, #tpu.memory_space<vmem>>, vector<1x4x32xf32>,
      %cst_7 = arith.constant 0.000000e+00 : f32
      %12 = vector.broadcast %cst_7 : f32 to vector<1x16x8xf32>
      %c0_8 = arith.constant 0 : index
      %c4 = arith.constant 4 : index
      %c0_9 = arith.constant 0 : index
      %13 = vector.load %arg4[%c0_8, %c4, %c0_9] : memref<1x24x32xf32, #tpu.memory_space<vmem>>, vector<1x16x8xf32>
      tpu.vector_store %arg4[%c0_8, %c4, %c0_9], %12 {strides = array<i32>} : memref<1x24x32xf32, #tpu.memory_space<vmem>>, vector<1x16x8xf32>,
      %cst_10 = arith.constant 0.000000e+00 : f32
      %14 = vector.broadcast %cst_10 : f32 to vector<1x16x8xf32>
      %c0_11 = arith.constant 0 : index
      %c4_12 = arith.constant 4 : index
      %c24 = arith.constant 24 : index
      %15 = vector.load %arg4[%c0_11, %c4_12, %c24] : memref<1x24x32xf32, #tpu.memory_space<vmem>>, vector<1x16x8xf32>
      tpu.vector_store %arg4[%c0_11, %c4_12, %c24], %14 {strides = array<i32>} : memref<1x24x32xf32, #tpu.memory_space<vmem>>, vector<1x16x8xf32>,
      %c0_13 = arith.constant 0 : index
      %c0_14 = arith.constant 0 : index
      %c0_15 = arith.constant 0 : index
      %16 = vector.load %arg3[%c0_13, %c0_14, %c0_15] : memref<1x16x16xf32, #tpu.memory_space<vmem>>, vector<1x16x16xf32>
      %c0_16 = arith.constant 0 : index
      %c4_17 = arith.constant 4 : index
      %c8 = arith.constant 8 : index
      %17 = vector.load %arg4[%c0_16, %c4_17, %c8] : memref<1x24x32xf32, #tpu.memory_space<vmem>>, vector<1x16x16xf32>
      tpu.vector_store %arg4[%c0_16, %c4_17, %c8], %16 {strides = array<i32>} : memref<1x24x32xf32, #tpu.memory_space<vmem>>, vector<1x16x16xf32>,
    } else {
    }
    %true = arith.constant true
    %5 = arith.xori %2, %true : i1
    %6 = arith.extui %5 : i1 to i32
    %c0_i32_1 = arith.constant 0 : i32
    %7 = arith.cmpi ne, %6, %c0_i32_1 : i32
    scf.if %7 {
      %cst = arith.constant 0.000000e+00 : f32
      %8 = vector.broadcast %cst : f32 to vector<1x24x32xf32>
      %c0 = arith.constant 0 : index
      %c0_2 = arith.constant 0 : index
      %c0_3 = arith.constant 0 : index
      %9 = vector.load %arg4[%c0, %c0_2, %c0_3] : memref<1x24x32xf32, #tpu.memory_space<vmem>>, vector<1x24x32xf32>
      tpu.vector_store %arg4[%c0, %c0_2, %c0_3], %8 {strides = array<i32>} : memref<1x24x32xf32, #tpu.memory_space<vmem>>, vector<1x24x32xf32>,
    } else {
    }
    return
  }
  func.func @transform_0(%arg0: i32, %arg1: memref<10xi32, #tpu.memory_space<smem>>, %arg2: memref<10xi32, #tpu.memory_space<smem>>) -> (i32, i32, i32) {
    %0 = arith.index_cast %arg0 : i32 to index
    %1 = memref.load %arg1[%0] : memref<10xi32, #tpu.memory_space<smem>>
    %c0_i32 = arith.constant 0 : i32
    %c0_i32_0 = arith.constant 0 : i32
    %c0_i32_1 = arith.constant 0 : i32
    return %1, %c0_i32, %c0_i32_0 : i32, i32, i32
  }
  func.func @transform_1(%arg0: i32, %arg1: memref<10xi32, #tpu.memory_space<smem>>, %arg2: memref<10xi32, #tpu.memory_space<smem>>) -> (i32, i32, i32) {
    %c0_i32 = arith.constant 0 : i32
    %c0_i32_0 = arith.constant 0 : i32
    %c0_i32_1 = arith.constant 0 : i32
    return %arg0, %c0_i32, %c0_i32_0 : i32, i32, i32
  }
}

</mosaic_0001>

<bundles_post_ra>
// kernel: tpu_custom_call.1
= control target key start
LH: loop header
LB: loop body
LE: loop exit
PB: predicated region body
PF: predicated region fallthrough
CT: control target
= control target key end

     0   :  { %s779_s0 = inlined_call_operand.hbm [shape: s32[10], index: 0, kind: input, shape index: {}]   ;;  %s780_s2 = inlined_call_operand.hbm [shape: f32[8,16,16], index: 2, kind: input, shape index: {}]   ;;  %s781_s3 = inlined_call_operand.hbm [shape: f32[10,24,32], index: 3, kind: output, shape index: {}]   ;;  %s782_s1 = inlined_call_operand.vmem [shape: s32[10], index: 1, kind: input, shape index: {}]  }
   0x1   :  { %s370_s14 = scalar_lea.hbm %s779_s0, 16 }
   0x2   :  { %p371_p0 = scmp.ne.s32.totalorder %s779_s0, %s370_s14  ;;  %p374_p1 = scmp.lt.u32.totalorder %s370_s14, %s779_s0 }
   0x4   :  { %p376_p2 = pnand %p374_p1, %p371_p0 }
   0x6   :  { %379 = shalt.err (!%p376_p2)  }
   0x7   :  { %s516_s19 = smov [#allocation3]   ;;  %s10_s24 = sshll.u32 %s782_s1, 4  ;;  %s11_s24 = int_to_ptr.vmem [resolvable:$true] %s10_s24 }
   0x8   :  { %9 = dma.hbm_to_smem %s779_s0, 16, %s516_s19, [#allocation2] }
   0x9   :  { %s380_s25 = scalar_lea.vmem %s11_s24, 16  ;;  %p385_p4 = scmp.lt.s32.totalorder %s11_s24, %s11_s24 }
   0xa   :  { %p381_p3 = scmp.ne.s32.totalorder %s11_s24, %s380_s25  ;;  %p386_p5 = scmp.lt.s32.totalorder %s380_s25, %s380_s25 }
   0xc   :  { %p387_p6 = por %p386_p5, %p385_p4 }
   0xe   :  { %p388_p7 = pnand %p387_p6, %p381_p3 }
  0x10   :  { %391 = shalt.err (!%p388_p7)  }
  0x11   :  { %s517_s26 = smov [#allocation4]  }
  0x12   :  { %13 = dma.vmem_to_smem %s11_s24, 16, %s517_s26, [#allocation2] }
  0x13   :  { %478 = dma.done.wait [#allocation2], 32 }
  0x14   :  { %479 = vsyncadd [#allocation2], 4294967264 }
  0x15   :  { %15 = sfence }
  0x16   :  { %16 = vsyncpa [#allocation6], 0 }
  0x17   :  { %18 = vsyncpa [#allocation6 + $0x1], 0 }
  0x18   :  { %19 = vsyncpa [#allocation7], 0 }
  0x19   :  { %21 = vsyncpa [#allocation7 + $0x1], 0  ;;  %s562_s0 = smov 0   ;;  %s564_s1 = smov 0  }
  0x1a   :  { %s566_s27 = smov 0   ;;  %s568_s28 = smov 0  }
  0x1b   :  { %s570_s29 = smov 0   ;;  %s572_s30 = smov 0  }
  0x1c   :  { %s574_s4 = smov 0  }
  0x1d LB: > { %s596_s5 = sadd.s32 4294967295, %s514_s4   ;;  %s271_s6 = sadd.s32 4294967294, %s514_s4   ;;  %s514_s4 = sphi %s574_s4, %s800_s4   ;;  %s510_s30 = sphi %s572_s30, %s799_s30   ;;  %s506_s29 = sphi %s570_s29, %s798_s29   ;;  %s502_s28 = sphi %s568_s28, %s797_s28   ;;  %s498_s27 = sphi %s566_s27, %s796_s27   ;;  %s494_s1 = sphi %s564_s1, %s795_s1   ;;  %s490_s0 = sphi %s562_s0, %s794_s0  }
  0x1e   : > { %s600_s7 = sadd.s32 1, %s514_s4   ;;  %s31_s8 = sld [smem:[#allocation3 + %s514_s4]] }
  0x1f   : > { %s32_s9 = sld [smem:[#allocation3 + %s600_s7]]  ;;  %s36_s10 = sadd.s32 1, %s510_s30 }
  0x20   : > { %p43_p8 = scmp.ne.s32.totalorder %s510_s30, %s506_s29  ;;  %p44_p9 = scmp.eq.s32.totalorder %s514_s4, 0 }
  0x21   : > { %p49_p10 = scmp.ne.s32.totalorder %s506_s29, %s502_s28  ;;  %p50_p11 = scmp.eq.s32.totalorder %s596_s5, 0 }
  0x22   : > { %p610_p12 = por %p44_p9, %p43_p8  ;;  %s59_s12 = ssub.s32 %s514_s4, %s600_s7 }
  0x23   : > { %p616_p13 = por %p50_p11, %p49_p10  ;;  %p60_p0 = scmp.eq.s32.totalorder %s59_s12, 0 }
  0x24   : > { %s62_s14 = sadd.s32 1, %s498_s27  ;;  %p72_p1 = scmp.ne.s32.totalorder %s498_s27, %s494_s1 }
  0x25   : > { %s786_s13 = scalar_select %p616_p13, 1, 0 }
  0x26   : > { %s33_s15 = ssub.s32 %s31_s8, %s32_s9  ;;  %p73_p2 = scmp.eq.s32.totalorder %s596_s5, 9 }
  0x27   : > { %p34_p3 = scmp.eq.s32.totalorder %s33_s15, 0  ;;  %p78_p4 = scmp.ne.s32.totalorder %s494_s1, %s490_s0 }
  0x28   : > { %s627_s16 = scalar_select %p60_p0, %s498_s27, %s62_s14  }
  0x29   : > { %s630_s17 = scalar_select %p34_p3, %s510_s30, %s36_s10  }
  0x2a   : > { %p632_p5 = por %p73_p2, %p72_p1  ;;  %p79_p6 = scmp.eq.s32.totalorder %s271_s6, 9 }
  0x2b   : > { %p303_p7 = scmp.lt.s32.totalorder %s514_s4, 10  ;;  %s99_s20 = sand.u32 1, %s510_s30  }
  0x2c   : > { %s787_s18 = scalar_select %p632_p5, 1, 0 }
  0x2d   : > { %p637_p8 = por %p79_p6, %p78_p4  ;;  %s274_s21 = sshll.u32 %s99_s20, 4 }
  0x2e   : > { %p644_p9 = pnand %p303_p7, %p610_p12  ;;  %s103_s26 = scalar_lea.vmem [#allocation5], %s274_s21 }
  0x2f   : > { %s788_s19 = scalar_select %p637_p8, 1, 0 }
  0x30   : > { %s287_s23 = scalar_select %p610_p12, [#allocation3], [#allocation9] }
  0x31   : > { %s288_s24 = scalar_select %p610_p12, %s514_s4, 0 }
  0x32   : > { %s802_s23 = smov (!%p303_p7, %s287_s23), [#allocation10]  ;;  %s111_s28 = sshll.u32 %s103_s26, 4  ;;  %s655_s28 = int_to_ptr.vmem [resolvable:$true] %s111_s28 }
  0x33   : > { %s804_s24 = smov (!%p303_p7, %s288_s24), 0  ;;  %p277_p10 = scmp.ge.s32.totalorder %s514_s4, 1 }
  0x34   : > { %s104_s25 = sld [smem:[%s802_s23 + %s804_s24]]  ;;  %p119_p11 = scmp.lt.s32.totalorder %s514_s4, 11 }
  0x35   : > { %s666_s12 = scalar_lea.sflag [#allocation6], %s99_s20  ;;  %p394_p1 = pneg %p644_p9 }
  0x36   : > { %p657_p0 = pnand %p277_p10, %p119_p11  ;;  %s397_s23 = scalar_lea.hbm %s780_s2, 2048 }
  0x3a   : > { %s284_s8 = sshll.u32 %s104_s25, 8 }
  0x3b   : > { %s664_s11 = scalar_lea.hbm %s780_s2, %s284_s8 }
  0x3c   : > { %s392_s14 = scalar_lea.hbm %s664_s11, 256  ;;  %p398_p4 = scmp.lt.u32.totalorder %s664_s11, %s780_s2 }
  0x3d   : > { %p393_p12 = scmp.ne.s32.totalorder %s664_s11, %s392_s14  ;;  %p399_p6 = scmp.lt.u32.totalorder %s397_s23, %s392_s14 }
  0x3e   : > { %p401_p10 = scmp.lt.u32.totalorder %s392_s14, %s664_s11 }
  0x3f   : > { %p395_p2 = pnand %p394_p1, %p393_p12  ;;  %p400_p7 = por %p399_p6, %p398_p4 }
  0x41   : > { %p396_p3 = pneg %p395_p2  ;;  %p402_p11 = por %p401_p10, %p400_p7 }
  0x43   : > { %p403_p8 = pnand %p402_p11, %p396_p3 }
  0x45   : > { %406 = shalt.err (!%p403_p8)
}
  0x46   : > { %s407_s20 = scalar_lea.vmem %s655_s28, 256  ;;  %s518_s26 = smov [#allocation5]  }
  0x47   : > { %p408_p12 = scmp.ne.s32.totalorder %s655_s28, %s407_s20  ;;  %s412_s8 = sshll.u32 %s518_s26, 4  ;;  %s413_s8 = int_to_ptr.vmem [resolvable:$false] %s412_s8 }
  0x48   : > { %s414_s9 = scalar_lea.vmem %s413_s8, 512  ;;  %p415_p13 = scmp.lt.s32.totalorder %s655_s28, %s413_s8 }
  0x49   : > { %p410_p2 = pnand %p408_p12, %p394_p1  ;;  %p416_p4 = scmp.lt.s32.totalorder %s414_s9, %s407_s20 }
  0x4b   : > { %p411_p5 = pneg %p410_p2  ;;  %p417_p6 = por %p416_p4, %p415_p13 }
  0x4d   : > { %p418_p7 = pnand %p417_p6, %p411_p5 }
  0x4f   : > { %421 = shalt.err (!%p418_p7)
}
  0x50   : > { %s519_s10 = smov 128   ;;  %s520_s14 = smov 8  }
  0x51   : > { %298 = dma.hbm_to_vmem [thread:$0]  (!%p644_p9), %s664_s11, 256, %s655_s28, %s666_s12, %s519_s10, %s519_s10, %s520_s14  }
  0x52   : > { %123 = sbr.rel (%p657_p0) target bundleno = 253 (0xfd), region = 24  ;;  %s125_s15 = sand.u32 (!%p657_p0), 1, %s506_s29  }
  0x53   : > { %s278_s21 = sshll.u32 (!%p657_p0), %s125_s15, 4  ;;  %s126_s23 = scalar_lea.sflag (!%p657_p0), [#allocation6], %s125_s15 }
  0x54   : > { %s129_s24 = scalar_lea.vmem (!%p657_p0), [#allocation5], %s278_s21  ;;  %p791_p13 = scmp.ne.s32.totalorder (!%p657_p0), %s786_s13, 0 }
  0x59   : > { %481 = dma.done.wait (%p791_p13), %s126_s23, 256  }
  0x5a   : > { %483 = vsyncadd (%p791_p13), %s126_s23, 4294967040  ;;  %s145_s25 = sand.u32 1, %s494_s1   ;;  %s149_s22 = sld [smem:[#allocation4 + %s596_s5]] }
  0x5b   : > { %s285_s28 = smul.u32 24, %s145_s25 }
  0x5d   : > { %s705_s6 = scalar_lea.vmem [#allocation8], %s285_s28 }
  0x60   : > { %p279_p5 = scmp.eq.s32.totalorder %s149_s22, 0 }
  0x61   : > { %v163_v0 = vld [vmem:[%s129_s24] sm:$0xff] (!%p279_p5)  ;;  %vm154_vm0 = vcmask (!%p279_p5), 257024   ;;  %s521_s13 = smov (!%p279_p5), 8   ;;  %v522_v1 = vmov (!%p279_p5), 0.0   ;;  %vm157_vm1 = vcmask (!%p279_p5), 64512   ;;  %vm160_vm2 = vcmask (!%p279_p5), 261312  }
  0x62   : > { %153 = sbr.rel (%p279_p5) target bundleno = 218 (0xda), region = 32  ;;  %167 = vrot.lane.b32.xlu0 (!%p279_p5), %v163_v0, %s521_s13  ;;  %155 = vst.msk [vmem:[%s705_s6] sm:$0xf] (!%p279_p5), %vm154_vm0, %v522_v1  ;;  %156 = vst.msk [vmem:[%s705_s6 + $0x14] sm:$0xf] (!%p279_p5), %vm154_vm0, %v522_v1  ;;  %v164_v2 = vld [vmem:[%s129_s24 + $0x8] sm:$0xff] (!%p279_p5) }
  0x63   : > { %158 = vst.msk [vmem:[%s705_s6 + $0x4] sm:$0xff] (!%p279_p5), %vm157_vm1, %v522_v1  ;;  %159 = vst.msk [vmem:[%s705_s6 + $0xc] sm:$0xff] (!%p279_p5), %vm157_vm1, %v522_v1  ;;  %vm173_vm3 = vcmask (!%p279_p5), 195648  }
  0x64   : > { %161 = vst.msk [vmem:[%s705_s6 + $0x4] sm:$0xff] (!%p279_p5), %vm160_vm2, %v522_v1  ;;  %162 = vst.msk [vmem:[%s705_s6 + $0xc] sm:$0xff] (!%p279_p5), %vm160_vm2, %v522_v1 }
  0x66   : > { %169 = vrot.lane.b32.xlu0 (!%p279_p5), %v164_v2, %s521_s13 }
  0xd4   : > { %v168_v3 = vpop.permute.xlu0 %167 }
  0xd5   : > { %174 = vst.msk [vmem:[%s705_s6 + $0x4] sm:$0xff] %vm173_vm3, %v168_v3 }
  0xd8   : > { %v170_v4 = vpop.permute.xlu0 %169 }
  0xd9   : > { %175 = vst.msk [vmem:[%s705_s6 + $0xc] sm:$0xff] %vm173_vm3, %v170_v4 }
  0xda PF: > { %p280_p8 = scmp.ne.s32.totalorder %s149_s22, 0 }
  0xdb   : > { %vm180_vm4 = vcmask (!%p280_p8), 261120   ;;  %v523_v5 = vmov (!%p280_p8), 0.0  }
  0xdc   : > { %179 = sbr.rel (%p280_p8) target bundleno = 227 (0xe3), region = 36  ;;  %181 = vst.msk [vmem:[%s705_s6] sm:$0xff] (!%p280_p8), %vm180_vm4, %v523_v5  ;;  %182 = vst.msk [vmem:[%s705_s6 + $0x8] sm:$0xff] (!%p280_p8), %vm180_vm4, %v523_v5 }
  0xdd   : > { %183 = vst.msk [vmem:[%s705_s6 + $0x10] sm:$0xff] (!%p280_p8), %vm180_vm4, %v523_v5 }
  0xe3 PF: > { %s286_s11 = smul.u32 384, %s596_s5  ;;  %s198_s12 = sshll.u32 %s705_s6, 4  ;;  %s725_s12 = int_to_ptr.vmem [resolvable:$true] %s198_s12 }
  0xe4   : > { %s729_s9 = scalar_lea.sflag [#allocation7], %s145_s25  ;;  %s422_s10 = scalar_lea.vmem %s725_s12, 384 }
  0xe5   : > { %s723_s8 = scalar_lea.hbm %s781_s3, %s286_s11  ;;  %p423_p9 = scmp.ne.s32.totalorder %s725_s12, %s422_s10 }
  0xe6   : > { %p792_p0 = scmp.ne.s32.totalorder %s787_s18, 0  ;;  %s524_s5 = smov [#allocation8]  }
  0xe7   : > { %s426_s14 = sshll.u32 %s524_s5, 4  ;;  %s427_s14 = int_to_ptr.vmem [resolvable:$false] %s426_s14 }
  0xe8   : > { %p424_p1 = pnand %p423_p9, %p792_p0  ;;  %s428_s15 = scalar_lea.vmem %s427_s14, 768 }
  0xe9   : > { %p429_p10 = scmp.lt.s32.totalorder %s725_s12, %s427_s14  ;;  %p430_p11 = scmp.lt.s32.totalorder %s428_s15, %s422_s10 }
  0xea   : > { %p425_p3 = pneg %p424_p1 }
  0xeb   : > { %p431_p12 = por %p430_p11, %p429_p10 }
  0xed   : > { %p432_p2 = pnand %p431_p12, %p425_p3 }
  0xef   : > { %435 = shalt.err (!%p432_p2)
}
  0xf0   : > { %s436_s21 = scalar_lea.hbm %s723_s8, 384  ;;  %s440_s25 = scalar_lea.hbm %s781_s3, 3840 }
  0xf1   : > { %p437_p4 = scmp.ne.s32.totalorder %s723_s8, %s436_s21  ;;  %p441_p13 = scmp.lt.u32.totalorder %s723_s8, %s781_s3 }
  0xf2   : > { %p442_p5 = scmp.lt.u32.totalorder %s440_s25, %s436_s21  ;;  %p444_p9 = scmp.lt.u32.totalorder %s436_s21, %s723_s8 }
  0xf3   : > { %p438_p6 = pnand %p437_p4, %p792_p0 }
  0xf4   : > { %p443_p8 = por %p442_p5, %p441_p13 }
  0xf5   : > { %p439_p7 = pneg %p438_p6 }
  0xf6   : > { %p445_p1 = por %p444_p9, %p443_p8 }
  0xf8   : > { %p446_p3 = pnand %p445_p1, %p439_p7 }
  0xfa   : > { %449 = shalt.err (!%p446_p3)
}
  0xfb   : > { %s525_s6 = smov 128   ;;  %s526_s13 = smov 8  }
  0xfc   : > { %291 = dma.vmem_to_hbm [thread:$0]  (%p792_p0), %s725_s12, 384, %s723_s8, %s729_s9, %s525_s6, %s525_s6, %s526_s13  }
  0xfd PF: > { %p304_p10 = scmp.ge.s32.totalorder %s514_s4, 2  ;;  %s213_s11 = sand.u32 1, %s490_s0  }
  0xfe   : > { %p793_p11 = scmp.ne.s32.totalorder %s788_s19, 0  ;;  %s214_s20 = scalar_lea.sflag [#allocation7], %s213_s11 }
 0x100   : > { %p300_p12 = pnand %p304_p10, %p793_p11 }
 0x102   : > { %485 = dma.done.wait (!%p300_p12), %s214_s20, 384  }
 0x103   : > { %487 = vsyncadd (!%p300_p12), %s214_s20, 4294966912  ;;  %p24_p0 = scmp.ge.s32.totalorder %s600_s7, 12   ;;  %s794_s0 = smov %s494_s1 }
 0x104   : > { %s795_s1 = smov %s498_s27  ;;  %s796_s27 = smov %s627_s16 }
 0x105   : > { %s797_s28 = smov %s506_s29  ;;  %s798_s29 = smov %s510_s30 }
 0x106   : > { %s799_s30 = smov %s630_s17  ;;  %s800_s4 = smov %s600_s7 }
 0x107   :  { %26 = sbr.rel (!%p24_p0) target bundleno = 29 (0x1d), region = 77 }
 0x10e   :  { %219 = vsyncpa [#allocation6], 1 }
 0x10f   :  { %221 = vsyncpa [#allocation6 + $0x1], 1 }
 0x110   :  { %222 = vsyncpa [#allocation7], 1 }
 0x111   :  { %224 = vsyncpa [#allocation7 + $0x1], 1 }

</bundles_post_ra>
